<compile_context>
chip_gen: v6e
topology: v6e:2x2x1
jax: 0.10.0
libtpu: 0.0.40
codegen_flags: <defaults>
</compile_context>

<pallas_src>
import functools

import jax
import jax.numpy as jnp
from jax.experimental import pallas as pl
from jax.experimental.pallas import tpu as pltpu


@functools.lru_cache(maxsize=1)
def _tpu_vmem_and_cores():
    """Returns (physical VMEM bytes per TensorCore, chip-has-2-TensorCores)."""
    vmem_cap = 64 << 20          # conservative fallback (v7x-sized VMEM)
    try:
        info = pltpu.get_tpu_info()
        vmem_cap = int(getattr(info, "vmem_capacity_bytes", vmem_cap))
    except Exception:
        pass
    try:
        kind = jax.devices()[0].device_kind.lower()
        two_tc = "v7" in kind
    except Exception:
        two_tc = vmem_cap <= (64 << 20)
    return vmem_cap, two_tc


def _se_kernel(x_ref, w1t_ref, b1_ref, w2t_ref, b2_ref, o_ref, *, inv_hw):
    # x_ref / o_ref: (TB, C, HW) tile for the current batch tile.
    x = x_ref[...]

    # Squeeze: global average pool over spatial positions.  f32 accumulation
    # only -- no full-tile f32 copy of x is materialized.
    avg = jnp.sum(x, axis=-1, dtype=jnp.float32) * inv_hw           # (TB, C)

    # Excitation: fc1 (1x1 conv) + ReLU -> fc2 (1x1 conv) + sigmoid, in f32.
    h = jnp.dot(avg, w1t_ref[...].astype(jnp.float32),
                preferred_element_type=jnp.float32) + b1_ref[...]   # (TB, Cr)
    h = jnp.maximum(h, 0.0)
    s = jnp.dot(h, w2t_ref[...].astype(jnp.float32),
                preferred_element_type=jnp.float32) + b2_ref[...]   # (TB, C)
    gate = jax.nn.sigmoid(s)                                        # (TB, C)

    # Scale: broadcast the per-channel gate over spatial positions; keep the
    # multiply / store in the storage dtype (only the tiny gate is cast).
    o_ref[...] = x * gate.astype(x.dtype)[:, :, None]


def _choose_batch_tile(B, per_b_bytes, vmem_budget_bytes, two_tc):
    """Pick the batch-tile size TB.

    The budget covers double-buffered input + output slabs (4 copies of a
    TB x C x HW tile).  On single-TensorCore chips (v5e/v6e) take the largest
    tile that fits; on 2-TC chips (v7x) also split so the parallel grid axis
    has >= 4 steps (>= 2 per core) for megacore sharding + pipelining.
    """
    tb = max(1, vmem_budget_bytes // (4 * per_b_bytes))
    tb = min(tb, B)
    if two_tc:
        if B >= 4:
            tb = min(tb, max(1, B // 4))
        elif B >= 2:
            tb = min(tb, max(1, B // 2))
    return int(max(1, tb))


@jax.jit
def se_block(x_nchw, w1, b1, w2, b2):
    """SEBlock forward: out = x * sigmoid(fc2(relu(fc1(mean_{H,W}(x))))).

    x_nchw: (B, C, H, W).  w1: (C//r, C), b1: (C//r,), w2: (C, C//r), b2: (C,).
    """
    B, C, H, W = x_nchw.shape
    Cr = w1.shape[0]
    HW = H * W
    itemsize = jnp.dtype(x_nchw.dtype).itemsize

    vmem_cap, two_tc = _tpu_vmem_and_cores()
    budget = int(vmem_cap * 0.70)            # ~90 MiB on v5e/v6e, ~45 MiB on v7x
    per_b = C * HW * itemsize
    TB = _choose_batch_tile(B, per_b, budget, two_tc)

    # Free, contiguous reshape (metadata only, no HBM pass); no padding and no
    # trailing slice -- the kernel reads/writes exactly B*C*HW elements.
    x = x_nchw.reshape(B, C, HW)

    # 1x1 convs == dense layers; pre-transpose so the kernel computes
    # (TB, C) @ (C, Cr) and (TB, Cr) @ (Cr, C) without in-kernel transposes.
    w1t = w1.T                               # (C, Cr)
    w2t = w2.T                               # (Cr, C)
    b1r = b1.reshape(1, Cr).astype(jnp.float32)
    b2r = b2.reshape(1, C).astype(jnp.float32)

    # Explicit VMEM limit: double-buffered in + out slabs + weights + margin,
    # clamped to ~75% of this chip's physical VMEM.
    slab = TB * C * HW * itemsize
    wbytes = (C * Cr + Cr + Cr * C + C) * 4
    vmem_bytes = 4 * slab + 4 * wbytes + (2 << 20)
    vmem_bytes = int(min(max(vmem_bytes, 16 << 20), int(vmem_cap * 0.75)))

    kernel = functools.partial(_se_kernel, inv_hw=float(1.0 / HW))

    out = pl.pallas_call(
        kernel,
        out_shape=jax.ShapeDtypeStruct((B, C, HW), x.dtype),
        grid_spec=pltpu.PrefetchScalarGridSpec(
            num_scalar_prefetch=0,
            grid=(pl.cdiv(B, TB),),
            in_specs=[
                pl.BlockSpec((TB, C, HW), lambda b: (b, 0, 0)),  # x slab
                pl.BlockSpec((C, Cr), lambda b: (0, 0)),         # w1^T
                pl.BlockSpec((1, Cr), lambda b: (0, 0)),         # b1
                pl.BlockSpec((Cr, C), lambda b: (0, 0)),         # w2^T
                pl.BlockSpec((1, C), lambda b: (0, 0)),          # b2
            ],
            out_specs=pl.BlockSpec((TB, C, HW), lambda b: (b, 0, 0)),
        ),
        compiler_params=pltpu.CompilerParams(
            dimension_semantics=("parallel",),
            vmem_limit_bytes=vmem_bytes,
        ),
    )(x, w1t, b1r, w2t, b2r)

    return out.reshape(B, C, H, W)


def _reference(x, w1, b1, w2, b2):
    avg = jnp.mean(x, axis=(2, 3), keepdims=True)                  # (B, C, 1, 1)
    h = jnp.einsum('bcij,dc->bdij', avg, w1) + b1[None, :, None, None]
    h = jnp.maximum(h, 0.0)
    s = jnp.einsum('bdij,cd->bcij', h, w2) + b2[None, :, None, None]
    return x * jax.nn.sigmoid(s)


if __name__ == "__main__":
    # Small but non-trivial shapes: HW = 144 is NOT a multiple of 128
    # (exercises the masked tail store) and B = 4 exercises batch tiling on
    # 2-TensorCore chips.  reduction=16 matches the PyTorch default.
    B, C, H, W = 4, 64, 12, 12
    reduction = 16
    Cr = C // reduction

    key = jax.random.PRNGKey(0)
    kx, k1, k2, k3, k4 = jax.random.split(key, 5)

    x = jax.random.normal(kx, (B, C, H, W), dtype=jnp.float32)
    # Conv2d 1x1 weights == dense weights.
    w1 = jax.random.normal(k1, (Cr, C), dtype=jnp.float32) * 0.1
    b1 = jax.random.normal(k2, (Cr,), dtype=jnp.float32) * 0.1
    w2 = jax.random.normal(k3, (C, Cr), dtype=jnp.float32) * 0.1
    b2 = jax.random.normal(k4, (C,), dtype=jnp.float32) * 0.1

    out = se_block(x, w1, b1, w2, b2)
    out = jax.block_until_ready(out)

    ref = _reference(x, w1, b1, w2, b2)
    assert out.shape == (B, C, H, W)
    max_err = float(jnp.max(jnp.abs(out - ref)))
    assert jnp.allclose(out, ref, atol=1e-5, rtol=1e-5), max_err

    print("KERNEL_OK")
</pallas_src>

<mosaic_0001>
module attributes {stable_mosaic.version = 11 : i64} {
  func.func @_se_kernel(%arg0: i32, %arg1: memref<4x64x144xf32, #tpu.memory_space<vmem>>, %arg2: memref<64x4xf32, #tpu.memory_space<vmem>>, %arg3: memref<1x4xf32, #tpu.memory_space<vmem>>, %arg4: memref<4x64xf32, #tpu.memory_space<vmem>>, %arg5: memref<1x64xf32, #tpu.memory_space<vmem>>, %arg6: memref<4x64x144xf32, #tpu.memory_space<vmem>>) attributes {dimension_semantics = [#tpu.dimension_semantics<parallel>], iteration_bounds = array<i64: 1>, scalar_prefetch = 0 : i64, scratch_operands = 0 : i64, tpu.core_type = #tpu.core_type<tc>, window_params = [{transform_indices = @transform_0, window_bounds = array<i64: 4, 64, 144>}, {pipeline_mode = #tpu.pipeline_mode<synchronous>, transform_indices = @transform_1, window_bounds = array<i64: 64, 4>}, {pipeline_mode = #tpu.pipeline_mode<synchronous>, transform_indices = @transform_2, window_bounds = array<i64: 1, 4>}, {pipeline_mode = #tpu.pipeline_mode<synchronous>, transform_indices = @transform_3, window_bounds = array<i64: 4, 64>}, {pipeline_mode = #tpu.pipeline_mode<synchronous>, transform_indices = @transform_4, window_bounds = array<i64: 1, 64>}, {transform_indices = @transform_5, window_bounds = array<i64: 4, 64, 144>}]} {
    %c0 = arith.constant 0 : index
    %c0_0 = arith.constant 0 : index
    %c0_1 = arith.constant 0 : index
    %0 = vector.load %arg1[%c0, %c0_0, %c0_1] : memref<4x64x144xf32, #tpu.memory_space<vmem>>, vector<4x64x144xf32>
    %cst = arith.constant dense<0.000000e+00> : vector<4x64xf32>
    %1 = vector.multi_reduction <add>, %0, %cst [2] : vector<4x64x144xf32> to vector<4x64xf32>
    %cst_2 = arith.constant 0.0069444445 : f32
    %2 = vector.broadcast %cst_2 : f32 to vector<4x64xf32>
    %3 = arith.mulf %1, %2 : vector<4x64xf32>
    %c0_3 = arith.constant 0 : index
    %c0_4 = arith.constant 0 : index
    %4 = vector.load %arg2[%c0_3, %c0_4] : memref<64x4xf32, #tpu.memory_space<vmem>>, vector<64x4xf32>
    %cst_5 = arith.constant dense<0.000000e+00> : vector<4x4xf32>
    %5 = tpu.matmul %3, %4, %cst_5 {dimension_numbers = #tpu.dot_dimension_numbers<[1], [0], [0], [1], [0, 0, 1, 1], [], []>} : vector<4x64xf32>, vector<64x4xf32>, vector<4x4xf32> -> vector<4x4xf32>
    %c0_6 = arith.constant 0 : index
    %c0_7 = arith.constant 0 : index
    %6 = vector.load %arg3[%c0_6, %c0_7] : memref<1x4xf32, #tpu.memory_space<vmem>>, vector<1x4xf32>
    %7 = vector.broadcast %6 : vector<1x4xf32> to vector<4x4xf32>
    %8 = arith.addf %5, %7 : vector<4x4xf32>
    %cst_8 = arith.constant 0.000000e+00 : f32
    %9 = vector.broadcast %cst_8 : f32 to vector<4x4xf32>
    %10 = arith.maximumf %8, %9 : vector<4x4xf32>
    %c0_9 = arith.constant 0 : index
    %c0_10 = arith.constant 0 : index
    %11 = vector.load %arg4[%c0_9, %c0_10] : memref<4x64xf32, #tpu.memory_space<vmem>>, vector<4x64xf32>
    %cst_11 = arith.constant dense<0.000000e+00> : vector<4x64xf32>
    %12 = tpu.matmul %10, %11, %cst_11 {dimension_numbers = #tpu.dot_dimension_numbers<[1], [0], [0], [1], [0, 0, 1, 1], [], []>} : vector<4x4xf32>, vector<4x64xf32>, vector<4x64xf32> -> vector<4x64xf32>
    %c0_12 = arith.constant 0 : index
    %c0_13 = arith.constant 0 : index
    %13 = vector.load %arg5[%c0_12, %c0_13] : memref<1x64xf32, #tpu.memory_space<vmem>>, vector<1x64xf32>
    %14 = vector.broadcast %13 : vector<1x64xf32> to vector<4x64xf32>
    %15 = arith.addf %12, %14 : vector<4x64xf32>
    %16 = arith.negf %15 : vector<4x64xf32>
    %17 = math.exp %16 : vector<4x64xf32>
    %cst_14 = arith.constant 1.000000e+00 : f32
    %18 = vector.broadcast %cst_14 : f32 to vector<4x64xf32>
    %19 = arith.addf %18, %17 : vector<4x64xf32>
    %20 = arith.divf %18, %19 : vector<4x64xf32>
    %21 = vector.shape_cast %20 : vector<4x64xf32> to vector<4x64x1xf32>
    %22 = vector.broadcast %21 : vector<4x64x1xf32> to vector<4x64x144xf32>
    %23 = arith.mulf %0, %22 : vector<4x64x144xf32>
    %c0_15 = arith.constant 0 : index
    %c0_16 = arith.constant 0 : index
    %c0_17 = arith.constant 0 : index
    %24 = vector.load %arg6[%c0_15, %c0_16, %c0_17] : memref<4x64x144xf32, #tpu.memory_space<vmem>>, vector<4x64x144xf32>
    tpu.vector_store %arg6[%c0_15, %c0_16, %c0_17], %23 {strides = array<i32>} : memref<4x64x144xf32, #tpu.memory_space<vmem>>, vector<4x64x144xf32>,
    return
  }
  func.func @transform_0(%arg0: i32) -> (i32, i32, i32) {
    %c0_i32 = arith.constant 0 : i32
    %c0_i32_0 = arith.constant 0 : i32
    %c0_i32_1 = arith.constant 0 : i32
    return %arg0, %c0_i32, %c0_i32_0 : i32, i32, i32
  }
  func.func @transform_1(%arg0: i32) -> (i32, i32) {
    %c0_i32 = arith.constant 0 : i32
    %c0_i32_0 = arith.constant 0 : i32
    %c0_i32_1 = arith.constant 0 : i32
    return %c0_i32, %c0_i32_0 : i32, i32
  }
  func.func @transform_2(%arg0: i32) -> (i32, i32) {
    %c0_i32 = arith.constant 0 : i32
    %c0_i32_0 = arith.constant 0 : i32
    %c0_i32_1 = arith.constant 0 : i32
    return %c0_i32, %c0_i32_0 : i32, i32
  }
  func.func @transform_3(%arg0: i32) -> (i32, i32) {
    %c0_i32 = arith.constant 0 : i32
    %c0_i32_0 = arith.constant 0 : i32
    %c0_i32_1 = arith.constant 0 : i32
    return %c0_i32, %c0_i32_0 : i32, i32
  }
  func.func @transform_4(%arg0: i32) -> (i32, i32) {
    %c0_i32 = arith.constant 0 : i32
    %c0_i32_0 = arith.constant 0 : i32
    %c0_i32_1 = arith.constant 0 : i32
    return %c0_i32, %c0_i32_0 : i32, i32
  }
  func.func @transform_5(%arg0: i32) -> (i32, i32, i32) {
    %c0_i32 = arith.constant 0 : i32
    %c0_i32_0 = arith.constant 0 : i32
    %c0_i32_1 = arith.constant 0 : i32
    return %arg0, %c0_i32, %c0_i32_0 : i32, i32, i32
  }
}

</mosaic_0001>

<bundles_post_ra>
// kernel: se_block.1
= control target key start
LH: loop header
LB: loop body
LE: loop exit
PB: predicated region body
PF: predicated region fallthrough
CT: control target
= control target key end

     0   :  { %vm84_vm0 = vcmask 130048   ;;  %vm956_vm1 = vmmov 0   ;;  %vm303_vm2 = vcmask 130112   ;;  %vm310_vm3 = vcmask 195712   ;;  %s1834_s0 = inlined_call_operand.vmem [shape: f32[4,64,144], index: 0, kind: input, shape index: {}]   ;;  %s1835_s1 = inlined_call_operand.vmem [shape: f32[64,4], index: 1, kind: input, shape index: {}]   ;;  %s1836_s3 = inlined_call_operand.vmem [shape: f32[4,64], index: 3, kind: input, shape index: {}]   ;;  %s1837_s2 = inlined_call_operand.vmem [shape: f32[1,4], index: 2, kind: input, shape index: {}]   ;;  %s1838_s4 = inlined_call_operand.vmem [shape: f32[1,64], index: 4, kind: input, shape index: {}]   ;;  %s1839_s5 = inlined_call_operand.vmem [shape: f32[4,64,144], index: 5, kind: output, shape index: {}]  }
   0x1   :  { %v990_v0 = vld [vmem:[%s1834_s0 + $0x80] sm:$0xff]  ;;  %v995_v1 = vld [vmem:[%s1834_s0 + $0x88] sm:$0xff]  ;;  %v1012_v5 = vld [vmem:[%s1834_s0 + $0x90] sm:$0xff]  ;;  %vm317_vm4 = vcmask 261312   ;;  %vm324_vm5 = vcmask 326912   ;;  %vm331_vm6 = vcmask 392512  }
   0x2   :  { %v1000_v2 = vld [vmem:[%s1834_s0] sm:$0xff]  ;;  %v117_v3 = vsel %vm84_vm0, %v995_v1, 0.0  ;;  %v1007_v4 = vld [vmem:[%s1834_s0 + $0x8] sm:$0xff]  ;;  %1885 = vst [vmem:[#allocation2_spill] sm:$0xff] %v1012_v5  ;;  %v1017_v6 = vld [vmem:[%s1834_s0 + $0x98] sm:$0xff]  ;;  %vm338_vm7 = vcmask 458112  }
   0x3   :  { %1886 = vst [vmem:[#allocation3_spill] sm:$0xff] %v1017_v6  ;;  %v118_v7 = vadd.f32 %v117_v3, %v990_v0  ;;  %v85_v8 = vsel %vm84_vm0, %v1007_v4, 0.0  ;;  %v121_v9 = vsel %vm84_vm0, %v1017_v6, 0.0  ;;  %v1027_v10 = vld [vmem:[%s1834_s0 + $0x10] sm:$0xff]  ;;  %v1032_v11 = vld [vmem:[%s1834_s0 + $0x18] sm:$0xff]  ;;  %v1040_v14 = vld [vmem:[%s1834_s0 + $0xa8] sm:$0xff] }
   0x4   :  { %v86_v12 = vadd.f32 %v85_v8, %v1000_v2  ;;  %v89_v13 = vsel %vm84_vm0, %v1032_v11, 0.0  ;;  %1887 = vst [vmem:[#allocation4_spill] sm:$0xff] %v1040_v14  ;;  %v1045_v15 = vld [vmem:[%s1834_s0 + $0x28] sm:$0xff]  ;;  %v122_v16 = vadd.f32 %v121_v9, %v1012_v5  ;;  %v1052_v18 = vld [vmem:[%s1834_s0 + $0xa0] sm:$0xff]  ;;  %v125_v19 = vsel %vm84_vm0, %v1040_v14, 0.0  ;;  %v1066_v22 = vld [vmem:[%s1834_s0 + $0x118] sm:$0xff] }
   0x5   :  { %119 = vadd.xlane.f32.xlu1 %v118_v7  ;;  %v90_v17 = vadd.f32 %v89_v13, %v1027_v10  ;;  %v1059_v20 = vld [vmem:[%s1834_s0 + $0x20] sm:$0xff]  ;;  %v93_v21 = vsel %vm84_vm0, %v1045_v15, 0.0  ;;  %1888 = vst [vmem:[#allocation5_spill] sm:$0xff] %v1066_v22  ;;  %v1071_v23 = vld [vmem:[%s1834_s0 + $0x108] sm:$0xff]  ;;  %v126_v24 = vadd.f32 %v125_v19, %v1052_v18  ;;  %v1078_v26 = vld [vmem:[%s1834_s0 + $0x110] sm:$0xff]  ;;  %v153_v27 = vsel %vm84_vm0, %v1066_v22, 0.0 }
   0x6   :  { %87 = vadd.xlane.f32.xlu0 %v86_v12  ;;  %1889 = vst [vmem:[#allocation6_spill] sm:$0xff] %v1071_v23  ;;  %v94_v25 = vadd.f32 %v93_v21, %v1059_v20  ;;  %1890 = vst [vmem:[#allocation7_spill] sm:$0xff] %v1078_v26  ;;  %v1085_v28 = vld [vmem:[%s1834_s0 + $0x100] sm:$0xff]  ;;  %v149_v29 = vsel %vm84_vm0, %v1071_v23, 0.0  ;;  %v1092_v30 = vld [vmem:[%s1834_s0 + $0xb8] sm:$0xff]  ;;  %v154_v32 = vadd.f32 %v153_v27, %v1078_v26  ;;  %vm345_vm8 = vcmask 523712  }
   0x7   :  { %1891 = vst [vmem:[#allocation8_spill] sm:$0xff] %v1085_v28  ;;  %1892 = vst [vmem:[#allocation9_spill] sm:$0xff] %v1092_v30  ;;  %v1097_v31 = vld [vmem:[%s1834_s0 + $0x38] sm:$0xff]  ;;  %v150_v33 = vadd.f32 %v149_v29, %v1085_v28  ;;  %v1104_v34 = vld [vmem:[%s1834_s0 + $0xb0] sm:$0xff]  ;;  %v129_v35 = vsel %vm84_vm0, %v1092_v30, 0.0  ;;  %vm464_vm9 = vcmask 1041409  }
   0x8   :  { %1893 = vst [vmem:[#allocation10_spill] sm:$0xff] %v1104_v34  ;;  %v1111_v36 = vld [vmem:[%s1834_s0 + $0x30] sm:$0xff]  ;;  %v97_v37 = vsel %vm84_vm0, %v1097_v31, 0.0  ;;  %v1118_v38 = vld [vmem:[%s1834_s0 + $0x188] sm:$0xff]  ;;  %v130_v40 = vadd.f32 %v129_v35, %v1104_v34  ;;  %v1130_v42 = vld [vmem:[%s1834_s0 + $0x180] sm:$0xff]  ;;  %vm466_vm10 = vcmask 1042434  }
   0x9   :  { %123 = vadd.xlane.f32.xlu1 %v122_v16  ;;  %1894 = vst [vmem:[#allocation11_spill] sm:$0xff] %v1118_v38  ;;  %v1123_v39 = vld [vmem:[%s1834_s0 + $0x128] sm:$0xff]  ;;  %v98_v41 = vadd.f32 %v97_v37, %v1111_v36  ;;  %1896 = vst [vmem:[#allocation13_spill] sm:$0xff] %v1130_v42  ;;  %v181_v43 = vsel %vm84_vm0, %v1118_v38, 0.0  ;;  %v1137_v44 = vld [vmem:[%s1834_s0 + $0x120] sm:$0xff]  ;;  %vm468_vm11 = vcmask 1043459  }
   0xa   :  { %91 = vadd.xlane.f32.xlu0 %v90_v17  ;;  %1895 = vst [vmem:[#allocation12_spill] sm:$0xff] %v1123_v39  ;;  %1897 = vst [vmem:[#allocation14_spill] sm:$0xff] %v1137_v44  ;;  %v157_v45 = vsel %vm84_vm0, %v1123_v39, 0.0  ;;  %v1144_v46 = vld [vmem:[%s1834_s0 + $0x48] sm:$0xff]  ;;  %v1149_v47 = vld [vmem:[%s1834_s0 + $0x198] sm:$0xff]  ;;  %v182_v48 = vadd.f32 %v181_v43, %v1130_v42  ;;  %vm470_vm12 = vcmask 523264  }
   0xb   :  { %1898 = vst [vmem:[#allocation15_spill] sm:$0xff] %v1149_v47  ;;  %v158_v49 = vadd.f32 %v157_v45, %v1137_v44  ;;  %v1156_v50 = vld [vmem:[%s1834_s0 + $0x40] sm:$0xff]  ;;  %v101_v51 = vsel %vm84_vm0, %v1144_v46, 0.0  ;;  %v1163_v52 = vld [vmem:[%s1834_s0 + $0x190] sm:$0xff]  ;;  %v185_v53 = vsel %vm84_vm0, %v1149_v47, 0.0  ;;  %v1170_v54 = vld [vmem:[%s1834_s0 + $0x138] sm:$0xff] }
   0xc   :  { %1899 = vst [vmem:[#allocation16_spill] sm:$0xff] %v1163_v52  ;;  %1900 = vst [vmem:[#allocation17_spill] sm:$0xff] %v1170_v54  ;;  %v1175_v55 = vld [vmem:[%s1834_s0 + $0xc8] sm:$0xff]  ;;  %v102_v56 = vadd.f32 %v101_v51, %v1156_v50  ;;  %v186_v57 = vadd.f32 %v185_v53, %v1163_v52  ;;  %v1182_v58 = vld [vmem:[%s1834_s0 + $0x130] sm:$0xff]  ;;  %v161_v59 = vsel %vm84_vm0, %v1170_v54, 0.0  ;;  %vm556_vm13 = vcmask 1043456  }
   0xd   :  { %127 = vadd.xlane.f32.xlu1 %v126_v24  ;;  %1901 = vst [vmem:[#allocation18_spill] sm:$0xff] %v1175_v55  ;;  %1902 = vst [vmem:[#allocation19_spill] sm:$0xff] %v1182_v58  ;;  %v1189_v60 = vld [vmem:[%s1834_s0 + $0xc0] sm:$0xff]  ;;  %v133_v61 = vsel %vm84_vm0, %v1175_v55, 0.0  ;;  %v1196_v62 = vld [vmem:[%s1834_s0 + $0x58] sm:$0xff]  ;;  %v162_v3 = vadd.f32 %v161_v59, %v1182_v58  ;;  %vm552_vm14 = vcmask 31744  }
   0xe   :  { %95 = vadd.xlane.f32.xlu0 %v94_v25  ;;  %1903 = vst [vmem:[#allocation20_spill] sm:$0xff] %v1189_v60  ;;  %v1201_v63 = vld [vmem:[%s1834_s0 + $0x1a8] sm:$0xff]  ;;  %v134_v7 = vadd.f32 %v133_v61, %v1189_v60  ;;  %v1208_v8 = vld [vmem:[%s1834_s0 + $0x50] sm:$0xff]  ;;  %v105_v9 = vsel %vm84_vm0, %v1196_v62, 0.0  ;;  %v1215_v12 = vld [vmem:[%s1834_s0 + $0x1a0] sm:$0xff] }
   0xf   :  { %1904 = vst [vmem:[#allocation21_spill] sm:$0xff] %v1201_v63  ;;  %1905 = vst [vmem:[#allocation22_spill] sm:$0xff] %v1215_v12  ;;  %v189_v13 = vsel %vm84_vm0, %v1201_v63, 0.0  ;;  %v1222_v16 = vld [vmem:[%s1834_s0 + $0x148] sm:$0xff]  ;;  %v1227_v17 = vld [vmem:[%s1834_s0 + $0xd8] sm:$0xff]  ;;  %v106_v19 = vadd.f32 %v105_v9, %v1208_v8 }
  0x10   :  { %1906 = vst [vmem:[#allocation23_spill] sm:$0xff] %v1222_v16  ;;  %1907 = vst [vmem:[#allocation24_spill] sm:$0xff] %v1227_v17  ;;  %v190_v21 = vadd.f32 %v189_v13, %v1215_v12  ;;  %v1234_v24 = vld [vmem:[%s1834_s0 + $0x140] sm:$0xff]  ;;  %v165_v25 = vsel %vm84_vm0, %v1222_v16, 0.0  ;;  %v1241_v27 = vld [vmem:[%s1834_s0 + $0xd0] sm:$0xff]  ;;  %v137_v29 = vsel %vm84_vm0, %v1227_v17, 0.0 }
  0x11   :  { %155 = vadd.xlane.f32.xlu1 %v154_v32  ;;  %1908 = vst [vmem:[#allocation25_spill] sm:$0xff] %v1234_v24  ;;  %1909 = vst [vmem:[#allocation26_spill] sm:$0xff] %v1241_v27  ;;  %v1248_v32 = vld [vmem:[%s1834_s0 + $0x68] sm:$0xff]  ;;  %v166_v35 = vadd.f32 %v165_v25, %v1234_v24  ;;  %v138_v37 = vadd.f32 %v137_v29, %v1241_v27  ;;  %v1267_v43 = vld [vmem:[%s1834_s0 + $0x1b0] sm:$0xff] }
  0x12   :  { %151 = vadd.xlane.f32.xlu0 %v150_v33  ;;  %v1253_v33 = vld [vmem:[%s1834_s0 + $0x1b8] sm:$0xff]  ;;  %1911 = vst [vmem:[#allocation28_spill] sm:$0xff] %v1267_v43  ;;  %v1293_v59 = vld [vmem:[%s1834_s0 + $0xe0] sm:$0xff] }
  0x13   :  { %1910 = vst [vmem:[#allocation27_spill] sm:$0xff] %v1253_v33  ;;  %v193_v45 = vsel %vm84_vm0, %v1253_v33, 0.0  ;;  %1915 = vst [vmem:[#allocation32_spill] sm:$0xff] %v1293_v59  ;;  %v1319_v25 = vld [vmem:[%s1834_s0 + $0x1c0] sm:$0xff]  ;;  %v1364_v33 = vld [vmem:[%s1834_s0 + $0x170] sm:$0xff] }
  0x14   :  { %v194_v53 = vadd.f32 %v193_v45, %v1267_v43  ;;  %1917 = vst [vmem:[#allocation34_spill] sm:$0xff] %v1319_v25  ;;  %1924 = vst [vmem:[#allocation41_spill] sm:$0xff] %v1364_v33  ;;  %v1397_v52 = vld [vmem:[%s1834_s0 + $0x1e0] sm:$0xff] }
  0x15   :  { %131 = vadd.xlane.f32.xlu1 %v130_v40  ;;  %v1260_v40 = vld [vmem:[%s1834_s0 + $0x60] sm:$0xff]  ;;  %1929 = vst [vmem:[#allocation46_spill] sm:$0xff] %v1397_v52 }
  0x16   :  { %99 = vadd.xlane.f32.xlu0 %v98_v41  ;;  %v109_v41 = vsel %vm84_vm0, %v1248_v32, 0.0 }
  0x17   :  { %v110_v51 = vadd.f32 %v109_v41, %v1260_v40 }
  0x19   :  { %183 = vadd.xlane.f32.xlu1 %v182_v48  ;;  %v1274_v48 = vld [vmem:[%s1834_s0 + $0x158] sm:$0xff] }
  0x1a   :  { %159 = vadd.xlane.f32.xlu0 %v158_v49  ;;  %1912 = vst [vmem:[#allocation29_spill] sm:$0xff] %v1274_v48  ;;  %v1279_v49 = vld [vmem:[%s1834_s0 + $0xe8] sm:$0xff] }
  0x1b   :  { %1913 = vst [vmem:[#allocation30_spill] sm:$0xff] %v1279_v49  ;;  %v141_v61 = vsel %vm84_vm0, %v1279_v49, 0.0 }
  0x1c   :  { %v142_v13 = vadd.f32 %v141_v61, %v1293_v59 }
  0x1d   :  { %103 = vadd.xlane.f32.xlu1 %v102_v56  ;;  %v1286_v56 = vld [vmem:[%s1834_s0 + $0x150] sm:$0xff] }
  0x1e   :  { %187 = vadd.xlane.f32.xlu0 %v186_v57  ;;  %1914 = vst [vmem:[#allocation31_spill] sm:$0xff] %v1286_v56  ;;  %v169_v57 = vsel %vm84_vm0, %v1274_v48, 0.0  ;;  %v292_v48 = vlaneseq }
  0x1f   :  { %v170_v9 = vadd.f32 %v169_v57, %v1286_v56  ;;  %v1345_v57 = vld [vmem:[%s1834_s0 + $0xf0] sm:$0xff] }
  0x20   :  { %1921 = vst [vmem:[#allocation38_spill] sm:$0xff] %v1345_v57 }
  0x21   :  { %163 = vadd.xlane.f32.xlu1 %v162_v3  ;;  %v1300_v3 = vld [vmem:[%s1834_s0 + $0x78] sm:$0xff] }
  0x22   :  { %135 = vadd.xlane.f32.xlu0 %v134_v7  ;;  %v1305_v7 = vld [vmem:[%s1834_s0 + $0x1c8] sm:$0xff] }
  0x23   :  { %1916 = vst [vmem:[#allocation33_spill] sm:$0xff] %v1305_v7  ;;  %v197_v29 = vsel %vm84_vm0, %v1305_v7, 0.0  ;;  %v1371_v7 = vld [vmem:[%s1834_s0 + $0x1d0] sm:$0xff] }
  0x24   :  { %v198_v45 = vadd.f32 %v197_v29, %v1319_v25  ;;  %1925 = vst [vmem:[#allocation42_spill] sm:$0xff] %v1371_v7 }
  0x25   :  { %107 = vadd.xlane.f32.xlu1 %v106_v19  ;;  %v1312_v19 = vld [vmem:[%s1834_s0 + $0x70] sm:$0xff] }
  0x26   :  { %191 = vadd.xlane.f32.xlu0 %v190_v21  ;;  %v113_v21 = vsel %vm84_vm0, %v1300_v3, 0.0 }
  0x27   :  { %v114_v41 = vadd.f32 %v113_v21, %v1312_v19 }
  0x29   :  { %167 = vadd.xlane.f32.xlu1 %v166_v35  ;;  %v1326_v35 = vld [vmem:[%s1834_s0 + $0x168] sm:$0xff] }
  0x2a   :  { %139 = vadd.xlane.f32.xlu0 %v138_v37  ;;  %1918 = vst [vmem:[#allocation35_spill] sm:$0xff] %v1326_v35  ;;  %v1331_v37 = vld [vmem:[%s1834_s0 + $0xf8] sm:$0xff] }
  0x2b   :  { %1919 = vst [vmem:[#allocation36_spill] sm:$0xff] %v1331_v37  ;;  %v145_v61 = vsel %vm84_vm0, %v1331_v37, 0.0 }
  0x2c   :  { %v146_v29 = vadd.f32 %v145_v61, %v1345_v57 }
  0x2d   :  { %111 = vadd.xlane.f32.xlu1 %v110_v51  ;;  %v1338_v51 = vld [vmem:[%s1834_s0 + $0x160] sm:$0xff] }
  0x2e   :  { %195 = vadd.xlane.f32.xlu0 %v194_v53  ;;  %1920 = vst [vmem:[#allocation37_spill] sm:$0xff] %v1338_v51  ;;  %v173_v53 = vsel %vm84_vm0, %v1326_v35, 0.0  ;;  %v1431_v35 = vshrl.u32 %v292_v48, 7 }
  0x2f   :  { %v174_v21 = vadd.f32 %v173_v53, %v1338_v51  ;;  %v1383_v53 = vld [vmem:[%s1834_s0 + $0x1e8] sm:$0xff] }
  0x30   :  { %1927 = vst [vmem:[#allocation44_spill] sm:$0xff] %v1383_v53 }
  0x31   :  { %171 = vadd.xlane.f32.xlu1 %v170_v9  ;;  %v1352_v9 = vld [vmem:[%s1834_s0 + $0x178] sm:$0xff] }
  0x32   :  { %143 = vadd.xlane.f32.xlu0 %v142_v13  ;;  %1922 = vst [vmem:[#allocation39_spill] sm:$0xff] %v1352_v9  ;;  %v1357_v13 = vld [vmem:[%s1834_s0 + $0x1d8] sm:$0xff]  ;;  %v177_v43 = vsel %vm84_vm0, %v1352_v9, 0.0 }
  0x33   :  { %1923 = vst [vmem:[#allocation40_spill] sm:$0xff] %v1357_v13  ;;  %v178_v61 = vadd.f32 %v177_v43, %v1364_v33 }
  0x35   :  { %115 = vadd.xlane.f32.xlu1 %v114_v41  ;;  %v201_v41 = vsel %vm84_vm0, %v1357_v13, 0.0  ;;  %v1390_v13 = vld [vmem:[%s1834_s0 + $0x1f0] sm:$0xff] }
  0x36   :  { %199 = vadd.xlane.f32.xlu0 %v198_v45  ;;  %v1378_v45 = vld [vmem:[%s1834_s0 + $0x1f8] sm:$0xff]  ;;  %v202_v25 = vadd.f32 %v201_v41, %v1371_v7  ;;  %1928 = vst [vmem:[#allocation45_spill] sm:$0xff] %v1390_v13  ;;  %v955_v41 = vmov 0.0  }
  0x37   :  { %1926 = vst [vmem:[#allocation43_spill] sm:$0xff] %v1378_v45  ;;  %v209_v47 = vsel %vm84_vm0, %v1378_v45, 0.0  ;;  %925 = vmatprep.subr.mxu0 %v955_v41  ;;  %v252_v45 = vld [vmem:[%s1835_s1 + $0x38] sm:$0xff]  ;;  %944 = vmatprep.subr.mxu1 %v955_v41 }
  0x38   :  { %v210_v43 = vadd.f32 %v209_v47, %v1390_v13  ;;  %926 = vmatpush3.msra.mxu0 %v252_v45  ;;  %v250_v47 = vld [vmem:[%s1835_s1 + $0x28] sm:$0xff]  ;;  %v248_v45 = vld [vmem:[%s1835_s1 + $0x18] sm:$0xff]  ;;  %941 = vmatprep.mubr.msk.f32.mxu0 %vm956_vm1, %v955_v41 }
  0x39   :  { %175 = vadd.xlane.f32.xlu1 %v174_v21  ;;  %v205_v21 = vsel %vm84_vm0, %v1383_v53, 0.0  ;;  %927 = vmatprep.subr.mxu0 %v955_v41 }
  0x3a   :  { %147 = vadd.xlane.f32.xlu0 %v146_v29  ;;  %v206_v29 = vadd.f32 %v205_v21, %v1397_v52  ;;  %v247_v21 = vld [vmem:[%s1835_s1 + $0x10] sm:$0xff]  ;;  %946 = vmatprep.mubr.msk.f32.mxu1 %vm956_vm1, %v955_v41 }
  0x3d   :  { %179 = vadd.xlane.f32.xlu1 %v178_v61  ;;  %v251_v61 = vld [vmem:[%s1835_s1 + $0x30] sm:$0xff] }
  0x3e   :  { %203 = vadd.xlane.f32.xlu0 %v202_v25  ;;  %928 = vmatpush3.msra.mxu0 %v251_v61  ;;  %v249_v25 = vld [vmem:[%s1835_s1 + $0x20] sm:$0xff] }
  0x3f   :  { %929 = vmatprep.subr.mxu0 %v955_v41 }
  0x40   :  { %930 = vmatpush3.msra.mxu0 %v250_v47 }
  0x41   :  { %211 = vadd.xlane.f32.xlu1 %v210_v43  ;;  %931 = vmatprep.subr.mxu0 %v955_v41  ;;  %v246_v43 = vld [vmem:[%s1835_s1 + $0x8] sm:$0xff] }
  0x42   :  { %207 = vadd.xlane.f32.xlu0 %v206_v29  ;;  %932 = vmatpush3.msra.mxu0 %v249_v25  ;;  %v245_v29 = vld [vmem:[%s1835_s1] sm:$0xff] }
  0x43   :  { %933 = vmatprep.subr.mxu0 %v955_v41 }
  0x44   :  { %934 = vmatpush3.msra.mxu0 %v248_v45 }
  0x45   :  { %935 = vmatprep.subr.mxu0 %v955_v41 }
  0x46   :  { %936 = vmatpush3.msra.mxu0 %v247_v21 }
  0x47   :  { %937 = vmatprep.subr.mxu0 %v955_v41 }
  0x48   :  { %938 = vmatpush3.msra.mxu0 %v246_v43 }
  0x49   :  { %939 = vmatprep.subr.mxu0 %v955_v41 }
  0x4a   :  { %940 = vmatpush3.msra.mxu0 %v245_v29  ;;  %v293_v29 = vand.u32 127, %v292_v48 }
  0x4c   :  { %v298_v51 = vadd.s32 4294967288, %v293_v29  ;;  %v305_v54 = vadd.s32 4294967280, %v293_v29  ;;  %v312_v24 = vadd.s32 4294967272, %v293_v29  ;;  %v1438_v22 = vsub.s32 %v293_v29, %v1431_v35 }
  0x4d   :  { %v319_v26 = vadd.s32 4294967264, %v293_v29  ;;  %v326_v48 = vadd.s32 4294967256, %v293_v29  ;;  %v333_v37 = vadd.s32 4294967248, %v293_v29 }
  0x4e   :  { %v1441_v39 = vsub.s32 %v298_v51, %v1431_v35  ;;  %v1444_v44 = vsub.s32 %v305_v54, %v1431_v35  ;;  %v1451_v30 = vsub.s32 %v312_v24, %v1431_v35 }
  0x4f   :  { %v1454_v55 = vsub.s32 %v319_v26, %v1431_v35  ;;  %v1460_v6 = vsub.s32 %v333_v37, %v1431_v35 }
  0x8e   :  { %v120_v61 = vpop.xlane.xlu1 %119 }
  0x8f   :  { %v88_v47 = vpop.xlane.xlu0 %87  ;;  %v221_v23 = vmul.f32 0.0069444445, %v120_v61 }
  0x90   :  { %v213_v60 = vmul.f32 0.0069444445, %v88_v47 }
  0x92   :  { %v124_v25 = vpop.xlane.xlu1 %123 }
  0x93   :  { %v92_v45 = vpop.xlane.xlu0 %91  ;;  %v222_v28 = vmul.f32 0.0069444445, %v124_v25  ;;  %v1457_v25 = vsub.s32 %v326_v48, %v1431_v35 }
  0x94   :  { %v214_v27 = vmul.f32 0.0069444445, %v92_v45 }
  0x96   :  { %v128_v21 = vpop.xlane.xlu1 %127  ;;  %v302_v26 = vrot.slane %v214_v27, %v1441_v39 }
  0x97   :  { %v96_v13 = vpop.xlane.xlu0 %95  ;;  %v223_v49 = vmul.f32 0.0069444445, %v128_v21 }
  0x98   :  { %v215_v59 = vmul.f32 0.0069444445, %v96_v13  ;;  %v354_v13 = vrot.slane %v222_v28, %v1441_v39  ;;  %v297_v28 = vrot.slane %v213_v60, %v1438_v22 }
  0x9a   :  { %v156_v7 = vpop.xlane.xlu1 %155  ;;  %v309_v47 = vrot.slane %v215_v59, %v1444_v44 }
  0x9b   :  { %v152_v53 = vpop.xlane.xlu0 %151  ;;  %v230_v51 = vmul.f32 0.0069444445, %v156_v7  ;;  %v340_v7 = vadd.s32 4294967240, %v293_v29 }
  0x9c   :  { %v229_v54 = vmul.f32 0.0069444445, %v152_v53  ;;  %v359_v53 = vrot.slane %v223_v49, %v1444_v44 }
  0x9d   :  { %v393_v48 = vrot.slane %v230_v51, %v1441_v39 }
  0x9e   :  { %v132_v52 = vpop.xlane.xlu1 %131  ;;  %v389_v37 = vrot.slane %v229_v54, %v1438_v22  ;;  %v304_v54 = vsel %vm303_vm2, %v302_v26, %v297_v28 }
  0x9f   :  { %v100_v63 = vpop.xlane.xlu0 %99  ;;  %v224_v34 = vmul.f32 0.0069444445, %v132_v52  ;;  %v350_v52 = vrot.slane %v221_v23, %v1438_v22 }
  0xa0   :  { %v216_v61 = vmul.f32 0.0069444445, %v100_v63 }
  0xa1   :  { %v364_v14 = vrot.slane %v224_v34, %v1451_v30  ;;  %v355_v27 = vsel %vm303_vm2, %v354_v13, %v350_v52 }
  0xa2   :  { %v184_v43 = vpop.xlane.xlu1 %183  ;;  %v360_v34 = vsel %vm310_vm3, %v359_v53, %v355_v27 }
  0xa3   :  { %v160_v12 = vpop.xlane.xlu0 %159  ;;  %v365_v13 = vsel %vm317_vm4, %v364_v14, %v360_v34 }
  0xa4   :  { %v231_v24 = vmul.f32 0.0069444445, %v160_v12  ;;  %v316_v12 = vrot.slane %v216_v61, %v1451_v30  ;;  %v1479_v61 = vsub.s32 %v340_v7, %v1431_v35 }
  0xa6   :  { %v104_v9 = vpop.xlane.xlu1 %103 }
  0xa7   :  { %v188_v33 = vpop.xlane.xlu0 %187  ;;  %v217_v21 = vmul.f32 0.0069444445, %v104_v9  ;;  %v237_v9 = vmul.f32 0.0069444445, %v184_v43  ;;  %v394_v43 = vsel %vm303_vm2, %v393_v48, %v389_v37 }
  0xa8   :  { %v238_v63 = vmul.f32 0.0069444445, %v188_v33  ;;  %v398_v33 = vrot.slane %v231_v24, %v1444_v44 }
  0xa9   :  { %v323_v49 = vrot.slane %v217_v21, %v1454_v55  ;;  %v428_v21 = vrot.slane %v237_v9, %v1438_v22 }
  0xaa   :  { %v164_v38 = vpop.xlane.xlu1 %163  ;;  %v432_v60 = vrot.slane %v238_v63, %v1441_v39  ;;  %v399_v7 = vsel %vm310_vm3, %v398_v33, %v394_v43 }
  0xab   :  { %v136_v42 = vpop.xlane.xlu0 %135  ;;  %v232_v29 = vmul.f32 0.0069444445, %v164_v38  ;;  %v311_v38 = vsel %vm310_vm3, %v309_v47, %v304_v54 }
  0xac   :  { %v225_v59 = vmul.f32 0.0069444445, %v136_v42  ;;  %v318_v42 = vsel %vm317_vm4, %v316_v12, %v311_v38 }
  0xad   :  { %v403_v52 = vrot.slane %v232_v29, %v1451_v30  ;;  %v325_v53 = vsel %vm324_vm5, %v323_v49, %v318_v42 }
  0xae   :  { %v1427_v56 = vpop.xlane.xlu1 %107  ;;  %v369_v63 = vrot.slane %v225_v59, %v1454_v55 }
  0xaf   :  { %v1429_v41 = vpop.xlane.xlu0 %191  ;;  %v218_v24 = vmul.f32 0.0069444445, %v1427_v56  ;;  %v433_v56 = vsel %vm303_vm2, %v432_v60, %v428_v21  ;;  %v404_v29 = vsel %vm317_vm4, %v403_v52, %v399_v7 }
  0xb0   :  { %v239_v48 = vmul.f32 0.0069444445, %v1429_v41  ;;  %v370_v41 = vsel %vm324_vm5, %v369_v63, %v365_v13 }
  0xb2   :  { %v1433_v58 = vpop.xlane.xlu1 %167 }
  0xb3   :  { %v1435_v16 = vpop.xlane.xlu0 %139  ;;  %v233_v26 = vmul.f32 0.0069444445, %v1433_v58  ;;  %v330_v58 = vrot.slane %v218_v24, %v1457_v25 }
  0xb4   :  { %v226_v47 = vmul.f32 0.0069444445, %v1435_v16 }
  0xb5   :  { %v408_v16 = vrot.slane %v233_v26, %v1454_v55  ;;  %v332_v43 = vsel %vm331_vm6, %v330_v58, %v325_v53 }
  0xb6   :  { %v1446_v57 = vpop.xlane.xlu1 %111 }
  0xb7   :  { %v1448_v17 = vpop.xlane.xlu0 %195  ;;  %v219_v27 = vmul.f32 0.0069444445, %v1446_v57  ;;  %v409_v24 = vsel %vm324_vm5, %v408_v16, %v404_v29 }
  0xb8   :  { %v240_v28 = vmul.f32 0.0069444445, %v1448_v17  ;;  %v437_v17 = vrot.slane %v239_v48, %v1444_v44 }
  0xba   :  { %v172_v45 = vpop.xlane.xlu1 %171  ;;  %v442_v57 = vrot.slane %v240_v28, %v1451_v30  ;;  %v438_v53 = vsel %vm310_vm3, %v437_v17, %v433_v56 }
  0xbb   :  { %v144_v5 = vpop.xlane.xlu0 %143  ;;  %v234_v22 = vmul.f32 0.0069444445, %v172_v45 }
  0xbc   :  { %v227_v37 = vmul.f32 0.0069444445, %v144_v5  ;;  %v374_v5 = vrot.slane %v226_v47, %v1457_v25 }
  0xbd   :  { %v413_v34 = vrot.slane %v234_v22, %v1457_v25 }
  0xbe   :  { %v116_v23 = vpop.xlane.xlu1 %115  ;;  %v379_v60 = vrot.slane %v227_v37, %v1460_v6  ;;  %v375_v52 = vsel %vm331_vm6, %v374_v5, %v370_v41 }
  0xbf   :  { %v200_v51 = vpop.xlane.xlu0 %199  ;;  %v220_v45 = vmul.f32 0.0069444445, %v116_v23  ;;  %v337_v23 = vrot.slane %v219_v27, %v1460_v6  ;;  %v414_v63 = vsel %vm331_vm6, %v413_v34, %v409_v24 }
  0xc0   :  { %v241_v33 = vmul.f32 0.0069444445, %v200_v51  ;;  %v380_v47 = vsel %vm338_vm7, %v379_v60, %v375_v52  ;;  %v743_v52 = vsub.s32 3, %v1431_v35 }
  0xc1   :  { %v344_v26 = vrot.slane %v220_v45, %v1479_v61  ;;  %v339_v58 = vsel %vm338_vm7, %v337_v23, %v332_v43  ;;  %v673_v23 = vsub.s32 1, %v1431_v35 }
  0xc2   :  { %v176_v39 = vpop.xlane.xlu1 %175  ;;  %v447_v42 = vrot.slane %v241_v33, %v1454_v55  ;;  %v443_v55 = vsel %vm317_vm4, %v442_v57, %v438_v53 }
  0xc3   :  { %v148_v14 = vpop.xlane.xlu0 %147  ;;  %v235_v12 = vmul.f32 0.0069444445, %v176_v39 }
  0xc4   :  { %v228_v9 = vmul.f32 0.0069444445, %v148_v14 }
  0xc5   :  { %v418_v51 = vrot.slane %v235_v12, %v1460_v6  ;;  %v346_v12 = vsel %vm345_vm8, %v344_v26, %v339_v58 }
  0xc6   :  { %v180_v49 = vpop.xlane.xlu1 %179  ;;  %v384_v13 = vrot.slane %v228_v9, %v1479_v61 }
  0xc7   :  { %v236_v59 = vmul.f32 0.0069444445, %v180_v49  ;;  %v204_v54 = vpop.xlane.xlu0 %203  ;;  %v419_v48 = vsel %vm338_vm7, %v418_v51, %v414_v63  ;;  %v908_v49 = vld [vmem:[%s1837_s2] ss:$0 sm:$0xff]  ;;  %v638_v51 = vsub.s32 0, %v1431_v35 }
  0xc8   :  { %v242_v38 = vmul.f32 0.0069444445, %v204_v54  ;;  %v385_v22 = vsel %vm345_vm8, %v384_v13, %v380_v47  ;;  %v910_v54 = vld [vmem:[%s1838_s4] ss:$0 sm:$0xff] }
  0xc9   :  { %v423_v44 = vrot.slane %v236_v59, %v1479_v61  ;;  %v465_v16 = vsel %vm464_vm9, %v385_v22, %v346_v12  ;;  %v1932_v12 = vld [vmem:[#allocation3_spill] sm:$0xff] }
  0xca   :  { %v212_v21 = vpop.xlane.xlu1 %211  ;;  %v452_v39 = vrot.slane %v242_v38, %v1457_v25  ;;  %v448_v25 = vsel %vm324_vm5, %v447_v42, %v443_v55 }
  0xcb   :  { %v208_v30 = vpop.xlane.xlu0 %207  ;;  %v244_v7 = vmul.f32 0.0069444445, %v212_v21  ;;  %v424_v28 = vsel %vm345_vm8, %v423_v44, %v419_v48  ;;  %v708_v44 = vsub.s32 2, %v1431_v35 }
  0xcc   :  { %v243_v14 = vmul.f32 0.0069444445, %v208_v30  ;;  %v453_v9 = vsel %vm331_vm6, %v452_v39, %v448_v25  ;;  %v467_v27 = vsel %vm466_vm10, %v424_v28, %v465_v16  ;;  %v1930_v25 = vld [vmem:[#allocation4_spill] sm:$0xff] }
  0xcd   :  { %v462_v37 = vrot.slane %v244_v7, %v1479_v61 }
  0xce   :  { %v457_v56 = vrot.slane %v243_v14, %v1460_v6  ;;  %v544_v6 = vld [vmem:[%s1836_s3] sm:$0xf] }
  0xcf   :  { %945 = vmatpush3.msk.msra.mxu1 %vm556_vm13, %v544_v6 }
  0xd0   :  { %v458_v29 = vsel %vm338_vm7, %v457_v56, %v453_v9 }
  0xd1   :  { %v463_v61 = vsel %vm345_vm8, %v462_v37, %v458_v29  ;;  %v1933_v29 = vld [vmem:[#allocation20_spill] sm:$0xff] }
  0xd2   :  { %v469_v33 = vsel %vm468_vm11, %v463_v61, %v467_v27  ;;  %v1934_v61 = vld [vmem:[#allocation18_spill] sm:$0xff] }
  0xd3   :  { %942 = vmatmul.mubr.msk.f32.vlgmr.msra.gmra.mxu0 %vm470_vm12, %v469_v33 }
 0x193   :  { %v539_v41 = vpop.f32.mrf.mxu0 }
 0x194   :  { %v540_v5 = vadd.f32 %v908_v49, %v539_v41  ;;  %v1935_v49 = vld [vmem:[#allocation10_spill] sm:$0xff] }
 0x195   :  { %v943_v45 = vpop.f32.mrf.mxu0 }
 0x196   :  { %v543_v59 = vmax.f32 %v540_v5, 0.0  ;;  %v1936_v5 = vld [vmem:[#allocation9_spill] sm:$0xff] }
 0x198   :  { %947 = vmatmul.mubr.msk.f32.vlgmr.msra.gmra.mxu1 %vm552_vm14, %v543_v59  ;;  %v1937_v59 = vld [vmem:[#allocation32_spill] sm:$0xff] }
 0x258   :  { %v626_v17 = vpop.f32.mrf.mxu1 }
 0x259   :  { %v627_v34 = vadd.f32 %v910_v54, %v626_v17  ;;  %v1938_v17 = vld [vmem:[#allocation30_spill] sm:$0xff] }
 0x25a   :  { %v948_v60 = vpop.f32.mrf.mxu1 }
 0x25b   :  { %v913_v38 = vmul.f32 -1.442695, %v627_v34 }
 0x25d   :  { %951 = vpow2.f32 %v913_v38 }
 0x26a   :  { %v952_v43 = vpop.eup %951 }
 0x26b   :  { %v633_v57 = vadd.f32 1.0, %v952_v43  ;;  %v1939_v43 = vld [vmem:[#allocation26_spill] sm:$0xff] }
 0x26d   :  { %953 = vrcp.f32 %v633_v57 }
 0x27a   :  { %v954_v13 = vpop.eup %953 }
 0x27b   :  { %v639_v24 = vrot.slane %v954_v13, %v638_v51  ;;  %v674_v42 = vrot.slane %v954_v13, %v673_v23  ;;  %v709_v21 = vrot.slane %v954_v13, %v708_v44  ;;  %v744_v26 = vrot.slane %v954_v13, %v743_v52  ;;  %v1940_v51 = vld [vmem:[#allocation24_spill] sm:$0xff] }
 0x27d   :  { %645 = vbcast.lane.b32.xlu1 %v639_v24, 264  ;;  %641 = vbcast.lane.b32.xlu0 %v639_v24, 256 }
 0x281   :  { %649 = vbcast.lane.b32.xlu1 %v639_v24, 272  ;;  %657 = vbcast.lane.b32.xlu0 %v639_v24, 288 }
 0x285   :  { %653 = vbcast.lane.b32.xlu1 %v639_v24, 280  ;;  %665 = vbcast.lane.b32.xlu0 %v639_v24, 304 }
 0x289   :  { %661 = vbcast.lane.b32.xlu1 %v639_v24, 296  ;;  %676 = vbcast.lane.b32.xlu0 %v674_v42, 256 }
 0x28d   :  { %669 = vbcast.lane.b32.xlu1 %v639_v24, 312  ;;  %684 = vbcast.lane.b32.xlu0 %v674_v42, 272  ;;  %v1941_v24 = vld [vmem:[#allocation8_spill] sm:$0xff] }
 0x291   :  { %680 = vbcast.lane.b32.xlu1 %v674_v42, 264  ;;  %692 = vbcast.lane.b32.xlu0 %v674_v42, 288 }
 0x295   :  { %688 = vbcast.lane.b32.xlu1 %v674_v42, 280  ;;  %700 = vbcast.lane.b32.xlu0 %v674_v42, 304 }
 0x299   :  { %696 = vbcast.lane.b32.xlu1 %v674_v42, 296  ;;  %711 = vbcast.lane.b32.xlu0 %v709_v21, 256 }
 0x29d   :  { %704 = vbcast.lane.b32.xlu1 %v674_v42, 312  ;;  %719 = vbcast.lane.b32.xlu0 %v709_v21, 272  ;;  %v1942_v42 = vld [vmem:[#allocation6_spill] sm:$0xff] }
 0x2a1   :  { %715 = vbcast.lane.b32.xlu1 %v709_v21, 264  ;;  %727 = vbcast.lane.b32.xlu0 %v709_v21, 288 }
 0x2a5   :  { %723 = vbcast.lane.b32.xlu1 %v709_v21, 280  ;;  %735 = vbcast.lane.b32.xlu0 %v709_v21, 304 }
 0x2a9   :  { %731 = vbcast.lane.b32.xlu1 %v709_v21, 296  ;;  %746 = vbcast.lane.b32.xlu0 %v744_v26, 256 }
 0x2ad   :  { %739 = vbcast.lane.b32.xlu1 %v709_v21, 312  ;;  %754 = vbcast.lane.b32.xlu0 %v744_v26, 272 }
 0x2b1   :  { %750 = vbcast.lane.b32.xlu1 %v744_v26, 264  ;;  %762 = vbcast.lane.b32.xlu0 %v744_v26, 288 }
 0x2b5   :  { %758 = vbcast.lane.b32.xlu1 %v744_v26, 280  ;;  %770 = vbcast.lane.b32.xlu0 %v744_v26, 304 }
 0x2b9   :  { %766 = vbcast.lane.b32.xlu1 %v744_v26, 296 }
 0x2bd   :  { %774 = vbcast.lane.b32.xlu1 %v744_v26, 312  ;;  %v1943_v26 = vld [vmem:[#allocation38_spill] sm:$0xff] }
 0x2ef   :  { %v646_v39 = vpop.permute.xlu1 %645  ;;  %v642_v30 = vpop.permute.xlu0 %641 }
 0x2f0   :  { %v778_v7 = vmul.f32 %v646_v39, %v1027_v10  ;;  %v779_v53 = vmul.f32 %v646_v39, %v1032_v11  ;;  %v776_v35 = vmul.f32 %v642_v30, %v1000_v2  ;;  %v777_v63 = vmul.f32 %v642_v30, %v1007_v4  ;;  %v1944_v30 = vld [vmem:[#allocation36_spill] sm:$0xff] }
 0x2f2   :  { %842 = vst [vmem:[%s1839_s5 + $0x10] sm:$0xff] %v778_v7  ;;  %843 = vst.msk [vmem:[%s1839_s5 + $0x18] sm:$0xff] %vm84_vm0, %v779_v53  ;;  %v1945_v53 = vld [vmem:[#allocation14_spill] sm:$0xff] }
 0x2f3   :  { %840 = vst [vmem:[%s1839_s5] sm:$0xff] %v776_v35  ;;  %841 = vst.msk [vmem:[%s1839_s5 + $0x8] sm:$0xff] %vm84_vm0, %v777_v63  ;;  %v650_v2 = vpop.permute.xlu1 %649  ;;  %v658_v4 = vpop.permute.xlu0 %657  ;;  %v1946_v63 = vld [vmem:[#allocation12_spill] sm:$0xff] }
 0x2f4   :  { %v780_v10 = vmul.f32 %v650_v2, %v1059_v20  ;;  %v781_v11 = vmul.f32 %v650_v2, %v1045_v15  ;;  %v784_v47 = vmul.f32 %v658_v4, %v1156_v50  ;;  %v785_v14 = vmul.f32 %v658_v4, %v1144_v46 }
 0x2f6   :  { %844 = vst [vmem:[%s1839_s5 + $0x20] sm:$0xff] %v780_v10  ;;  %845 = vst.msk [vmem:[%s1839_s5 + $0x28] sm:$0xff] %vm84_vm0, %v781_v11  ;;  %v1947_v11 = vld [vmem:[#allocation7_spill] sm:$0xff] }
 0x2f7   :  { %848 = vst [vmem:[%s1839_s5 + $0x40] sm:$0xff] %v784_v47  ;;  %849 = vst.msk [vmem:[%s1839_s5 + $0x48] sm:$0xff] %vm84_vm0, %v785_v14  ;;  %v654_v15 = vpop.permute.xlu1 %653  ;;  %v666_v20 = vpop.permute.xlu0 %665  ;;  %v1948_v14 = vld [vmem:[#allocation5_spill] sm:$0xff] }
 0x2f8   :  { %v782_v46 = vmul.f32 %v654_v15, %v1111_v36  ;;  %v783_v50 = vmul.f32 %v654_v15, %v1097_v31  ;;  %v788_v55 = vmul.f32 %v666_v20, %v1260_v40  ;;  %v789_v48 = vmul.f32 %v666_v20, %v1248_v32  ;;  %v1949_v20 = vld [vmem:[#allocation25_spill] sm:$0xff] }
 0x2fa   :  { %846 = vst [vmem:[%s1839_s5 + $0x30] sm:$0xff] %v782_v46  ;;  %847 = vst.msk [vmem:[%s1839_s5 + $0x38] sm:$0xff] %vm84_vm0, %v783_v50  ;;  %v1950_v50 = vld [vmem:[#allocation23_spill] sm:$0xff] }
 0x2fb   :  { %852 = vst [vmem:[%s1839_s5 + $0x60] sm:$0xff] %v788_v55  ;;  %853 = vst.msk [vmem:[%s1839_s5 + $0x68] sm:$0xff] %vm84_vm0, %v789_v48  ;;  %v662_v31 = vpop.permute.xlu1 %661  ;;  %v677_v36 = vpop.permute.xlu0 %676 }
 0x2fc   :  { %v786_v32 = vmul.f32 %v662_v31, %v1208_v8  ;;  %v787_v40 = vmul.f32 %v662_v31, %v1196_v62  ;;  %v792_v22 = vmul.f32 %v677_v36, %v990_v0  ;;  %v793_v37 = vmul.f32 %v677_v36, %v995_v1  ;;  %v1951_v36 = vld [vmem:[#allocation19_spill] sm:$0xff] }
 0x2fe   :  { %850 = vst [vmem:[%s1839_s5 + $0x50] sm:$0xff] %v786_v32  ;;  %851 = vst.msk [vmem:[%s1839_s5 + $0x58] sm:$0xff] %vm84_vm0, %v787_v40  ;;  %v1952_v40 = vld [vmem:[#allocation17_spill] sm:$0xff] }
 0x2ff   :  { %856 = vst [vmem:[%s1839_s5 + $0x80] sm:$0xff] %v792_v22  ;;  %857 = vst.msk [vmem:[%s1839_s5 + $0x88] sm:$0xff] %vm84_vm0, %v793_v37  ;;  %v670_v0 = vpop.permute.xlu1 %669  ;;  %v685_v1 = vpop.permute.xlu0 %684  ;;  %v1953_v37 = vld [vmem:[#allocation37_spill] sm:$0xff] }
 0x300   :  { %v790_v62 = vmul.f32 %v670_v0, %v1312_v19  ;;  %v791_v8 = vmul.f32 %v670_v0, %v1300_v3  ;;  %v796_v58 = vmul.f32 %v685_v1, %v1052_v18  ;;  %v797_v28 = vmul.f32 %v685_v1, %v1930_v25  ;;  %v1931_v19 = vld [vmem:[#allocation2_spill] sm:$0xff]  ;;  %v1954_v1 = vld [vmem:[#allocation35_spill] sm:$0xff] }
 0x301   :  { %v1955_v25 = vld [vmem:[#allocation31_spill] sm:$0xff] }
 0x302   :  { %854 = vst [vmem:[%s1839_s5 + $0x70] sm:$0xff] %v790_v62  ;;  %855 = vst.msk [vmem:[%s1839_s5 + $0x78] sm:$0xff] %vm84_vm0, %v791_v8 }
 0x303   :  { %860 = vst [vmem:[%s1839_s5 + $0xa0] sm:$0xff] %v796_v58  ;;  %861 = vst.msk [vmem:[%s1839_s5 + $0xa8] sm:$0xff] %vm84_vm0, %v797_v28  ;;  %v681_v18 = vpop.permute.xlu1 %680  ;;  %v693_v3 = vpop.permute.xlu0 %692 }
 0x304   :  { %v794_v56 = vmul.f32 %v681_v18, %v1931_v19  ;;  %v795_v9 = vmul.f32 %v681_v18, %v1932_v12  ;;  %v800_v16 = vmul.f32 %v693_v3, %v1933_v29  ;;  %v801_v27 = vmul.f32 %v693_v3, %v1934_v61  ;;  %v1956_v18 = vld [vmem:[#allocation29_spill] sm:$0xff]  ;;  %v1958_v12 = vld [vmem:[#allocation11_spill] sm:$0xff] }
 0x305   :  { %v1957_v19 = vld [vmem:[#allocation13_spill] sm:$0xff] }
 0x306   :  { %858 = vst [vmem:[%s1839_s5 + $0x90] sm:$0xff] %v794_v56  ;;  %859 = vst.msk [vmem:[%s1839_s5 + $0x98] sm:$0xff] %vm84_vm0, %v795_v9  ;;  %v1959_v61 = vld [vmem:[#allocation41_spill] sm:$0xff] }
 0x307   :  { %864 = vst [vmem:[%s1839_s5 + $0xc0] sm:$0xff] %v800_v16  ;;  %865 = vst.msk [vmem:[%s1839_s5 + $0xc8] sm:$0xff] %vm84_vm0, %v801_v27  ;;  %v689_v33 = vpop.permute.xlu1 %688  ;;  %v701_v6 = vpop.permute.xlu0 %700 }
 0x308   :  { %v798_v41 = vmul.f32 %v689_v33, %v1935_v49  ;;  %v799_v45 = vmul.f32 %v689_v33, %v1936_v5  ;;  %v804_v54 = vmul.f32 %v701_v6, %v1937_v59  ;;  %v805_v34 = vmul.f32 %v701_v6, %v1938_v17  ;;  %v1960_v33 = vld [vmem:[#allocation39_spill] sm:$0xff]  ;;  %v1961_v49 = vld [vmem:[#allocation22_spill] sm:$0xff]  ;;  %v1962_v5 = vld [vmem:[#allocation21_spill] sm:$0xff] }
 0x309   :  { %v1963_v17 = vld [vmem:[#allocation16_spill] sm:$0xff] }
 0x30a   :  { %862 = vst [vmem:[%s1839_s5 + $0xb0] sm:$0xff] %v798_v41  ;;  %863 = vst.msk [vmem:[%s1839_s5 + $0xb8] sm:$0xff] %vm84_vm0, %v799_v45 }
 0x30b   :  { %868 = vst [vmem:[%s1839_s5 + $0xe0] sm:$0xff] %v804_v54  ;;  %869 = vst.msk [vmem:[%s1839_s5 + $0xe8] sm:$0xff] %vm84_vm0, %v805_v34  ;;  %v697_v60 = vpop.permute.xlu1 %696  ;;  %v712_v38 = vpop.permute.xlu0 %711 }
 0x30c   :  { %v802_v57 = vmul.f32 %v697_v60, %v1939_v43  ;;  %v803_v13 = vmul.f32 %v697_v60, %v1940_v51  ;;  %v808_v23 = vmul.f32 %v712_v38, %v1941_v24  ;;  %v809_v44 = vmul.f32 %v712_v38, %v1942_v42  ;;  %v1964_v60 = vld [vmem:[#allocation15_spill] sm:$0xff]  ;;  %v1965_v43 = vld [vmem:[#allocation34_spill] sm:$0xff]  ;;  %v1966_v51 = vld [vmem:[#allocation33_spill] sm:$0xff] }
 0x30d   :  { %v1967_v42 = vld [vmem:[#allocation28_spill] sm:$0xff] }
 0x30e   :  { %866 = vst [vmem:[%s1839_s5 + $0xd0] sm:$0xff] %v802_v57  ;;  %867 = vst.msk [vmem:[%s1839_s5 + $0xd8] sm:$0xff] %vm84_vm0, %v803_v13 }
 0x30f   :  { %872 = vst [vmem:[%s1839_s5 + $0x100] sm:$0xff] %v808_v23  ;;  %873 = vst.msk [vmem:[%s1839_s5 + $0x108] sm:$0xff] %vm84_vm0, %v809_v44  ;;  %v705_v21 = vpop.permute.xlu1 %704  ;;  %v720_v52 = vpop.permute.xlu0 %719 }
 0x310   :  { %v806_v39 = vmul.f32 %v705_v21, %v1943_v26  ;;  %v807_v7 = vmul.f32 %v705_v21, %v1944_v30  ;;  %v812_v35 = vmul.f32 %v720_v52, %v1945_v53  ;;  %v813_v2 = vmul.f32 %v720_v52, %v1946_v63  ;;  %v1968_v21 = vld [vmem:[#allocation27_spill] sm:$0xff]  ;;  %v1969_v26 = vld [vmem:[#allocation46_spill] sm:$0xff]  ;;  %v1970_v30 = vld [vmem:[#allocation44_spill] sm:$0xff] }
 0x312   :  { %870 = vst [vmem:[%s1839_s5 + $0xf0] sm:$0xff] %v806_v39  ;;  %871 = vst.msk [vmem:[%s1839_s5 + $0xf8] sm:$0xff] %vm84_vm0, %v807_v7 }
 0x313   :  { %876 = vst [vmem:[%s1839_s5 + $0x120] sm:$0xff] %v812_v35  ;;  %877 = vst.msk [vmem:[%s1839_s5 + $0x128] sm:$0xff] %vm84_vm0, %v813_v2  ;;  %v716_v4 = vpop.permute.xlu1 %715  ;;  %v728_v10 = vpop.permute.xlu0 %727  ;;  %v1971_v35 = vld [vmem:[#allocation42_spill] sm:$0xff]  ;;  %v1972_v2 = vld [vmem:[#allocation40_spill] sm:$0xff] }
 0x314   :  { %v810_v47 = vmul.f32 %v716_v4, %v1947_v11  ;;  %v811_v15 = vmul.f32 %v716_v4, %v1948_v14  ;;  %v816_v46 = vmul.f32 %v728_v10, %v1949_v20  ;;  %v817_v55 = vmul.f32 %v728_v10, %v1950_v50  ;;  %v1973_v11 = vld [vmem:[#allocation45_spill] sm:$0xff]  ;;  %v1974_v14 = vld [vmem:[#allocation43_spill] sm:$0xff] }
 0x316   :  { %874 = vst [vmem:[%s1839_s5 + $0x110] sm:$0xff] %v810_v47  ;;  %875 = vst.msk [vmem:[%s1839_s5 + $0x118] sm:$0xff] %vm84_vm0, %v811_v15 }
 0x317   :  { %880 = vst [vmem:[%s1839_s5 + $0x140] sm:$0xff] %v816_v46  ;;  %881 = vst.msk [vmem:[%s1839_s5 + $0x148] sm:$0xff] %vm84_vm0, %v817_v55  ;;  %v724_v48 = vpop.permute.xlu1 %723  ;;  %v736_v31 = vpop.permute.xlu0 %735 }
 0x318   :  { %v814_v32 = vmul.f32 %v724_v48, %v1951_v36  ;;  %v815_v22 = vmul.f32 %v724_v48, %v1952_v40  ;;  %v820_v0 = vmul.f32 %v736_v31, %v1953_v37  ;;  %v821_v62 = vmul.f32 %v736_v31, %v1954_v1 }
 0x31a   :  { %878 = vst [vmem:[%s1839_s5 + $0x130] sm:$0xff] %v814_v32  ;;  %879 = vst.msk [vmem:[%s1839_s5 + $0x138] sm:$0xff] %vm84_vm0, %v815_v22 }
 0x31b   :  { %884 = vst [vmem:[%s1839_s5 + $0x160] sm:$0xff] %v820_v0  ;;  %885 = vst.msk [vmem:[%s1839_s5 + $0x168] sm:$0xff] %vm84_vm0, %v821_v62  ;;  %v732_v8 = vpop.permute.xlu1 %731  ;;  %v747_v58 = vpop.permute.xlu0 %746 }
 0x31c   :  { %v818_v28 = vmul.f32 %v732_v8, %v1955_v25  ;;  %v819_v3 = vmul.f32 %v732_v8, %v1956_v18  ;;  %v824_v56 = vmul.f32 %v747_v58, %v1957_v19  ;;  %v825_v9 = vmul.f32 %v747_v58, %v1958_v12 }
 0x31e   :  { %882 = vst [vmem:[%s1839_s5 + $0x150] sm:$0xff] %v818_v28  ;;  %883 = vst.msk [vmem:[%s1839_s5 + $0x158] sm:$0xff] %vm84_vm0, %v819_v3 }
 0x31f   :  { %888 = vst [vmem:[%s1839_s5 + $0x180] sm:$0xff] %v824_v56  ;;  %889 = vst.msk [vmem:[%s1839_s5 + $0x188] sm:$0xff] %vm84_vm0, %v825_v9  ;;  %v740_v29 = vpop.permute.xlu1 %739  ;;  %v755_v16 = vpop.permute.xlu0 %754 }
 0x320   :  { %v822_v27 = vmul.f32 %v740_v29, %v1959_v61  ;;  %v823_v6 = vmul.f32 %v740_v29, %v1960_v33  ;;  %v828_v41 = vmul.f32 %v755_v16, %v1961_v49  ;;  %v829_v45 = vmul.f32 %v755_v16, %v1962_v5 }
 0x322   :  { %886 = vst [vmem:[%s1839_s5 + $0x170] sm:$0xff] %v822_v27  ;;  %887 = vst.msk [vmem:[%s1839_s5 + $0x178] sm:$0xff] %vm84_vm0, %v823_v6 }
 0x323   :  { %892 = vst [vmem:[%s1839_s5 + $0x1a0] sm:$0xff] %v828_v41  ;;  %893 = vst.msk [vmem:[%s1839_s5 + $0x1a8] sm:$0xff] %vm84_vm0, %v829_v45  ;;  %v751_v59 = vpop.permute.xlu1 %750  ;;  %v763_v54 = vpop.permute.xlu0 %762 }
 0x324   :  { %v826_v34 = vmul.f32 %v751_v59, %v1963_v17  ;;  %v827_v38 = vmul.f32 %v751_v59, %v1964_v60  ;;  %v832_v57 = vmul.f32 %v763_v54, %v1965_v43  ;;  %v833_v13 = vmul.f32 %v763_v54, %v1966_v51 }
 0x326   :  { %890 = vst [vmem:[%s1839_s5 + $0x190] sm:$0xff] %v826_v34  ;;  %891 = vst.msk [vmem:[%s1839_s5 + $0x198] sm:$0xff] %vm84_vm0, %v827_v38 }
 0x327   :  { %896 = vst [vmem:[%s1839_s5 + $0x1c0] sm:$0xff] %v832_v57  ;;  %897 = vst.msk [vmem:[%s1839_s5 + $0x1c8] sm:$0xff] %vm84_vm0, %v833_v13  ;;  %v759_v24 = vpop.permute.xlu1 %758  ;;  %v771_v23 = vpop.permute.xlu0 %770 }
 0x328   :  { %v830_v44 = vmul.f32 %v759_v24, %v1967_v42  ;;  %v831_v52 = vmul.f32 %v759_v24, %v1968_v21  ;;  %v836_v39 = vmul.f32 %v771_v23, %v1969_v26  ;;  %v837_v7 = vmul.f32 %v771_v23, %v1970_v30 }
 0x32a   :  { %894 = vst [vmem:[%s1839_s5 + $0x1b0] sm:$0xff] %v830_v44  ;;  %895 = vst.msk [vmem:[%s1839_s5 + $0x1b8] sm:$0xff] %vm84_vm0, %v831_v52 }
 0x32b   :  { %900 = vst [vmem:[%s1839_s5 + $0x1e0] sm:$0xff] %v836_v39  ;;  %901 = vst.msk [vmem:[%s1839_s5 + $0x1e8] sm:$0xff] %vm84_vm0, %v837_v7  ;;  %v767_v53 = vpop.permute.xlu1 %766 }
 0x32c   :  { %v834_v63 = vmul.f32 %v767_v53, %v1971_v35  ;;  %v835_v4 = vmul.f32 %v767_v53, %v1972_v2 }
 0x32e   :  { %898 = vst [vmem:[%s1839_s5 + $0x1d0] sm:$0xff] %v834_v63  ;;  %899 = vst.msk [vmem:[%s1839_s5 + $0x1d8] sm:$0xff] %vm84_vm0, %v835_v4 }
 0x32f   :  { %v775_v10 = vpop.permute.xlu1 %774 }
 0x330   :  { %v838_v47 = vmul.f32 %v775_v10, %v1973_v11  ;;  %v839_v15 = vmul.f32 %v775_v10, %v1974_v14 }
 0x332   :  { %902 = vst [vmem:[%s1839_s5 + $0x1f0] sm:$0xff] %v838_v47  ;;  %903 = vst.msk [vmem:[%s1839_s5 + $0x1f8] sm:$0xff] %vm84_vm0, %v839_v15 }

</bundles_post_ra>
